<compile_context>
chip_gen: v6e
topology: v6e:2x2x1
jax: 0.10.0
libtpu: 0.0.40
codegen_flags: <defaults>
</compile_context>

<pallas_src>
import functools

import jax
import jax.numpy as jnp
from jax.experimental import pallas as pl
from jax.experimental.pallas import tpu as pltpu


def _round_up(x, m):
    return (x + m - 1) // m * m


# ----------------------------------------------------------------------------
# Fused kernel for ONE (batch element, output-channel tile):
#   seed_ref : SMEM (1,) int32 scalar-prefetch (dropout seed; unused in eval)
#   pat_ref  : (P, Kpad)  bf16 im2col patches for this batch element
#   w_ref    : (Kpad, Ct) bf16 rearranged conv weight tile
#   o_ref    : (P, Ct)    bf16 output tile
# ----------------------------------------------------------------------------
def _unet_down_kernel(seed_ref, pat_ref, w_ref, o_ref, *, norm, drop, eps,
                      slope):
    # Single MXU matmul, K = Kpad (multiple of 128), f32 accumulation.
    y = jnp.dot(pat_ref[...], w_ref[...], preferred_element_type=jnp.float32)

    if norm:
        # InstanceNorm2d: per-channel stats over the full spatial extent of
        # this batch element (channel tiling does not split the stats).
        # Two-pass (centered) variance in f32 -> no catastrophic cancellation.
        inv_p = 1.0 / y.shape[0]
        mean = jnp.sum(y, axis=0, keepdims=True) * inv_p
        centered = y - mean
        var = jnp.sum(centered * centered, axis=0, keepdims=True) * inv_p
        y = centered * jax.lax.rsqrt(var + eps)

    # LeakyReLU(0.2)
    y = jnp.where(y >= 0, y, slope * y)

    if drop:
        # Dropout(0.5), training mode: keep w.p. 0.5, scale kept values by 2.
        # Stateless lowbias32 hash of (seed, global element id) -- pure VPU
        # integer ops, lowers on Mosaic and in interpret mode.
        seed = seed_ref[0].astype(jnp.uint32)
        row = jax.lax.broadcasted_iota(jnp.int32, y.shape, 0).astype(jnp.uint32)
        col = jax.lax.broadcasted_iota(jnp.int32, y.shape, 1).astype(jnp.uint32)
        step = pl.program_id(0) * pl.num_programs(1) + pl.program_id(1)
        gid = ((step.astype(jnp.uint32) * jnp.uint32(y.shape[0]) + row)
               * jnp.uint32(y.shape[1]) + col)
        h = gid ^ (seed * jnp.uint32(0x9E3779B9))
        h = h ^ (h >> 16)
        h = h * jnp.uint32(0x7FEB352D)
        h = h ^ (h >> 15)
        h = h * jnp.uint32(0x846CA68B)
        h = h ^ (h >> 16)
        keep = (h & jnp.uint32(1)) == jnp.uint32(1)
        y = jnp.where(keep, 2.0 * y, 0.0)

    o_ref[...] = y.astype(o_ref.dtype)


# ----------------------------------------------------------------------------
# Wrapper: layout rearrangement (cheap XLA ops) + pallas_call.
# ----------------------------------------------------------------------------
def unet_down_pallas(x, w, *, norm_layer=True, use_dropout=True, training=False,
                     dropout_seed=0, c_tile=None, eps=1e-5, slope=0.2,
                     out_dtype=jnp.bfloat16):
    """x: (N, H, W, Cin) NHWC; w: (Cout, Cin, 4, 4) torch OIHW layout."""
    n, h, wd, cin = x.shape
    cout = w.shape[0]
    assert w.shape == (cout, cin, 4, 4)
    assert h % 2 == 0 and wd % 2 == 0, "UnetDown expects even spatial dims"
    oh, ow = h // 2, wd // 2
    p = oh * ow
    k = 16 * cin
    kpad = _round_up(k, 128)          # lane-dense MXU contraction dim
    cout_pad = _round_up(cout, 128)   # lane-dense output stores

    # im2col patches (N, P, Kpad) in bf16.  Operate on already-bf16 data so the
    # extra wrapper HBM pass is half-width.
    xb = x.astype(jnp.bfloat16)
    xp = jnp.pad(xb, ((0, 0), (1, 1), (1, 1), (0, 0)))
    cols = [xp[:, kh:kh + 2 * oh:2, kw:kw + 2 * ow:2, :]
            for kh in range(4) for kw in range(4)]
    patches = jnp.concatenate(cols, axis=-1).reshape(n, p, k)
    if kpad > k:
        patches = jnp.pad(patches, ((0, 0), (0, 0), (0, kpad - k)))

    # weight (Cout, Cin, 4, 4) -> (Kpad, Cout_pad), channel order matching
    # patches: feature index = (kh*4 + kw)*Cin + c.  Zero padding is exact.
    wcat = jnp.transpose(w, (2, 3, 1, 0)).reshape(k, cout)
    wcat = jnp.pad(wcat, ((0, kpad - k), (0, cout_pad - cout)))
    wcat = wcat.astype(jnp.bfloat16)

    # Output-channel tile: 256 fills the v6e/v7x MXU width, else 128.
    if c_tile is None:
        ct = 256 if cout_pad % 256 == 0 else 128
    else:
        ct = c_tile
        assert cout_pad % ct == 0
    nc = cout_pad // ct

    # Grid order: keep the larger operand VMEM-resident (its block index is
    # constant across the inner grid axis) to minimize HBM DMA bytes.
    pat_bytes = n * p * kpad * 2
    w_bytes = kpad * cout_pad * 2
    bytes_b_outer = pat_bytes + n * w_bytes      # grid=(n, nc): patches resident
    bytes_c_outer = nc * pat_bytes + w_bytes     # grid=(nc, n): weights resident
    weights_resident = bytes_c_outer < bytes_b_outer
    if weights_resident:
        grid = (nc, n)
        pat_map = lambda c, b, s: (b, 0, 0)
        w_map = lambda c, b, s: (0, c)
        out_map = lambda c, b, s: (b, 0, c)
    else:
        grid = (n, nc)
        pat_map = lambda b, c, s: (b, 0, 0)
        w_map = lambda b, c, s: (0, c)
        out_map = lambda b, c, s: (b, 0, c)

    drop = bool(use_dropout and training)
    seed = jnp.array([dropout_seed], jnp.int32)

    kernel = functools.partial(_unet_down_kernel, norm=bool(norm_layer),
                               drop=drop, eps=eps, slope=slope)

    # VMEM budget: double-buffered pipeline blocks + f32 in-kernel intermediates
    # (accumulator, centered copy, dropout hash, temporaries) + headroom.
    blk = 2 * (p * kpad * 2 + kpad * ct * 2 + p * ct * 2)
    interm = 4 * p * ct * 4
    vmem_limit = int(min(max(blk + interm + (4 << 20), 32 << 20), 96 << 20))

    hbm_bytes = (bytes_c_outer if weights_resident else bytes_b_outer) \
        + n * p * cout_pad * 2
    cost = pl.CostEstimate(
        flops=2 * n * p * kpad * cout_pad,
        transcendentals=(2 * n * cout_pad) if norm_layer else 0,
        bytes_accessed=int(hbm_bytes),
    )

    out = pl.pallas_call(
        kernel,
        out_shape=jax.ShapeDtypeStruct((n, p, cout_pad), out_dtype),
        grid_spec=pltpu.PrefetchScalarGridSpec(
            num_scalar_prefetch=1,
            grid=grid,
            in_specs=[
                pl.BlockSpec((None, p, kpad), pat_map),
                pl.BlockSpec((kpad, ct), w_map),
            ],
            out_specs=pl.BlockSpec((None, p, ct), out_map),
        ),
        compiler_params=pltpu.CompilerParams(
            dimension_semantics=("parallel", "parallel"),
            vmem_limit_bytes=vmem_limit,
        ),
        cost_estimate=cost,
    )(seed, patches, wcat)

    out = out.reshape(n, oh, ow, cout_pad)
    return out[:, :, :, :cout] if cout_pad != cout else out


# ----------------------------------------------------------------------------
# Pure-JAX f32 reference (eval mode: Dropout = identity).
# ----------------------------------------------------------------------------
def reference_forward(x, w, *, norm_layer=True, eps=1e-5, slope=0.2):
    out = jax.lax.conv_general_dilated(
        x, jnp.transpose(w, (2, 3, 1, 0)),               # OIHW -> HWIO
        window_strides=(2, 2), padding=((1, 1), (1, 1)),
        dimension_numbers=("NHWC", "HWIO", "NHWC"),
        precision=jax.lax.Precision.HIGHEST)
    if norm_layer:
        mean = jnp.mean(out, axis=(1, 2), keepdims=True)
        var = jnp.mean(jnp.square(out - mean), axis=(1, 2), keepdims=True)
        out = (out - mean) * jax.lax.rsqrt(var + eps)
    return jnp.where(out >= 0, out, slope * out)


if __name__ == "__main__":
    key = jax.random.PRNGKey(0)
    k_x, k_w = jax.random.split(key)

    N, H, W, Cin, Cout = 2, 16, 16, 8, 256
    x = jax.random.normal(k_x, (N, H, W, Cin), jnp.float32)
    w = jax.random.normal(k_w, (Cout, Cin, 4, 4), jnp.float32) * 0.05

    # 1) eval mode, norm_layer=True (default config, dropout inactive)
    out = unet_down_pallas(x, w, norm_layer=True, use_dropout=True,
                           training=False)
    out = jax.block_until_ready(out)
    assert out.shape == (N, H // 2, W // 2, Cout), out.shape
    out_f32 = out.astype(jnp.float32)
    ref = reference_forward(x, w, norm_layer=True)
    err = float(jnp.max(jnp.abs(out_f32 - ref)))
    assert err < 1e-1, f"norm path: max abs error {err}"    # bf16 ops + bf16 out

    # 2) eval mode, norm_layer=False
    out_nn = jax.block_until_ready(
        unet_down_pallas(x, w, norm_layer=False, use_dropout=True,
                         training=False)).astype(jnp.float32)
    ref_nn = reference_forward(x, w, norm_layer=False)
    err_nn = float(jnp.max(jnp.abs(out_nn - ref_nn)))
    assert err_nn < 5e-2, f"no-norm path: max abs error {err_nn}"

    # 3) training mode: Dropout(0.5) via stateless in-kernel hash
    out_tr = jax.block_until_ready(
        unet_down_pallas(x, w, norm_layer=True, use_dropout=True,
                         training=True, dropout_seed=123)).astype(jnp.float32)
    kept = out_tr != 0.0
    frac = float(jnp.mean(kept.astype(jnp.float32)))
    assert 0.45 < frac < 0.55, f"dropout keep fraction {frac}"
    err_tr = float(jnp.max(jnp.abs(jnp.where(kept, out_tr - 2.0 * ref, 0.0))))
    assert err_tr < 2e-1, f"dropout kept-value mismatch {err_tr}"

    print("KERNEL_OK")
</pallas_src>

<mosaic_0001>
module attributes {stable_mosaic.version = 11 : i64} {
  func.func @_unet_down_kernel(%arg0: i32, %arg1: i32, %arg2: memref<1xi32, #tpu.memory_space<smem>>, %arg3: memref<1x64x128xbf16, #tpu.memory_space<vmem>>, %arg4: memref<128x256xbf16, #tpu.memory_space<vmem>>, %arg5: memref<1x64x256xbf16, #tpu.memory_space<vmem>>) attributes {dimension_semantics = [#tpu.dimension_semantics<parallel>, #tpu.dimension_semantics<parallel>], iteration_bounds = array<i64: 1, 2>, scalar_prefetch = 1 : i64, scratch_operands = 0 : i64, tpu.core_type = #tpu.core_type<tc>, window_params = [{transform_indices = @transform_0, window_bounds = array<i64: 1, 64, 128>}, {transform_indices = @transform_1, window_bounds = array<i64: 128, 256>}, {transform_indices = @transform_2, window_bounds = array<i64: 1, 64, 256>}]} {
    %c0 = arith.constant 0 : index
    %c0_0 = arith.constant 0 : index
    %c0_1 = arith.constant 0 : index
    %0 = vector.load %arg3[%c0, %c0_0, %c0_1] : memref<1x64x128xbf16, #tpu.memory_space<vmem>>, vector<1x64x128xbf16>
    %1 = vector.shape_cast %0 : vector<1x64x128xbf16> to vector<64x128xbf16>
    %c0_2 = arith.constant 0 : index
    %c0_3 = arith.constant 0 : index
    %2 = vector.load %arg4[%c0_2, %c0_3] : memref<128x256xbf16, #tpu.memory_space<vmem>>, vector<128x256xbf16>
    %cst = arith.constant dense<0.000000e+00> : vector<64x256xf32>
    %3 = tpu.matmul %1, %2, %cst {dimension_numbers = #tpu.dot_dimension_numbers<[1], [0], [0], [1], [0, 0, 1, 1], [], []>} : vector<64x128xbf16>, vector<128x256xbf16>, vector<64x256xf32> -> vector<64x256xf32>
    %cst_4 = arith.constant dense<0.000000e+00> : vector<256xf32>
    %4 = vector.multi_reduction <add>, %3, %cst_4 [0] : vector<64x256xf32> to vector<256xf32>
    %5 = vector.shape_cast %4 : vector<256xf32> to vector<1x256xf32>
    %cst_5 = arith.constant 1.562500e-02 : f32
    %6 = vector.broadcast %cst_5 : f32 to vector<1x256xf32>
    %7 = arith.mulf %5, %6 : vector<1x256xf32>
    %8 = vector.broadcast %7 : vector<1x256xf32> to vector<64x256xf32>
    %9 = arith.subf %3, %8 : vector<64x256xf32>
    %10 = arith.mulf %9, %9 : vector<64x256xf32>
    %cst_6 = arith.constant dense<0.000000e+00> : vector<256xf32>
    %11 = vector.multi_reduction <add>, %10, %cst_6 [0] : vector<64x256xf32> to vector<256xf32>
    %12 = vector.shape_cast %11 : vector<256xf32> to vector<1x256xf32>
    %cst_7 = arith.constant 1.562500e-02 : f32
    %13 = vector.broadcast %cst_7 : f32 to vector<1x256xf32>
    %14 = arith.mulf %12, %13 : vector<1x256xf32>
    %cst_8 = arith.constant 9.99999974E-6 : f32
    %15 = vector.broadcast %cst_8 : f32 to vector<1x256xf32>
    %16 = arith.addf %14, %15 : vector<1x256xf32>
    %17 = math.rsqrt %16 : vector<1x256xf32>
    %18 = vector.broadcast %17 : vector<1x256xf32> to vector<64x256xf32>
    %19 = arith.mulf %9, %18 : vector<64x256xf32>
    %cst_9 = arith.constant 0.000000e+00 : f32
    %20 = vector.broadcast %cst_9 : f32 to vector<64x256xf32>
    %21 = arith.cmpf oge, %19, %20 : vector<64x256xf32>
    %cst_10 = arith.constant 2.000000e-01 : f32
    %22 = vector.broadcast %cst_10 : f32 to vector<64x256xf32>
    %23 = arith.mulf %22, %19 : vector<64x256xf32>
    %24 = arith.select %21, %19, %23 : vector<64x256xi1>, vector<64x256xf32>
    %25 = arith.truncf %24 : vector<64x256xf32> to vector<64x256xbf16>
    %c0_11 = arith.constant 0 : index
    %c0_12 = arith.constant 0 : index
    %c0_13 = arith.constant 0 : index
    %26 = vector.load %arg5[%c0_11, %c0_12, %c0_13] : memref<1x64x256xbf16, #tpu.memory_space<vmem>>, vector<1x64x256xbf16>
    %27 = vector.shape_cast %26 : vector<1x64x256xbf16> to vector<64x256xbf16>
    %28 = vector.shape_cast %25 : vector<64x256xbf16> to vector<1x64x256xbf16>
    tpu.vector_store %arg5[%c0_11, %c0_12, %c0_13], %28 {strides = array<i32>} : memref<1x64x256xbf16, #tpu.memory_space<vmem>>, vector<1x64x256xbf16>,
    return
  }
  func.func @transform_0(%arg0: i32, %arg1: i32, %arg2: memref<1xi32, #tpu.memory_space<smem>>) -> (i32, i32, i32) {
    %c0_i32 = arith.constant 0 : i32
    %c0_i32_0 = arith.constant 0 : i32
    %c0_i32_1 = arith.constant 0 : i32
    return %arg1, %c0_i32, %c0_i32_0 : i32, i32, i32
  }
  func.func @transform_1(%arg0: i32, %arg1: i32, %arg2: memref<1xi32, #tpu.memory_space<smem>>) -> (i32, i32) {
    %c0_i32 = arith.constant 0 : i32
    %c0_i32_0 = arith.constant 0 : i32
    return %c0_i32, %arg0 : i32, i32
  }
  func.func @transform_2(%arg0: i32, %arg1: i32, %arg2: memref<1xi32, #tpu.memory_space<smem>>) -> (i32, i32, i32) {
    %c0_i32 = arith.constant 0 : i32
    %c0_i32_0 = arith.constant 0 : i32
    return %arg1, %c0_i32, %arg0 : i32, i32, i32
  }
}

</mosaic_0001>

<bundles_post_ra>
// kernel: tpu_custom_call.1
= control target key start
LH: loop header
LB: loop body
LE: loop exit
PB: predicated region body
PF: predicated region fallthrough
CT: control target
= control target key end

     0   :  { %9 = vsyncpa [#allocation5], 0  ;;  %s1372_s0 = inlined_call_operand.<no memory space> [shape: s32[1], index: 0, kind: input, shape index: {}]   ;;  %s1373_s1 = inlined_call_operand.hbm [shape: bf16[2,64,128], index: 1, kind: input, shape index: {}]   ;;  %s1374_s2 = inlined_call_operand.hbm [shape: bf16[128,256], index: 2, kind: input, shape index: {}]   ;;  %s1375_s3 = inlined_call_operand.hbm [shape: bf16[2,64,256], index: 3, kind: output, shape index: {}]  }
   0x1   :  { %11 = vsyncpa [#allocation5 + $0x1], 0 }
   0x2   :  { %12 = vsyncpa [#allocation8], 0 }
   0x3   :  { %13 = vsyncpa [#allocation6], 0 }
   0x4   :  { %15 = vsyncpa [#allocation6 + $0x1], 0  ;;  %s1082_s12 = smov 0   ;;  %s1084_s13 = smov 0  }
   0x5   :  { %s1086_s14 = smov 0   ;;  %s1088_s0 = smov 0  }
   0x6   :  { %s1090_s15 = smov 0   ;;  %s1092_s16 = smov 0  }
   0x7 LB: > { %s729_s17 = sadd.s32 4294967295, %s1050_s16   ;;  %s730_s18 = sadd.s32 4294967294, %s1050_s16   ;;  %s1050_s16 = sphi %s1092_s16, %s21_s16   ;;  %s1046_s15 = sphi %s1090_s15, %s1393_s15   ;;  %s1042_s0 = sphi %s1088_s0, %s1392_s0   ;;  %s1038_s14 = sphi %s1086_s14, %s1391_s14   ;;  %s1034_s13 = sphi %s1084_s13, %s1390_s13   ;;  %s1030_s12 = sphi %s1082_s12, %s1389_s12  }
   0x8   : > { %p53_p0 = scmp.ne.s32.totalorder %s1034_s13, %s1030_s12  ;;  %p1116_p1 = scmp.eq.s32.totalorder %s729_s17, 0 }
   0x9   : > { %p1120_p2 = scmp.eq.s32.totalorder %s729_s17, 1  ;;  %p111_p3 = scmp.eq.s32.totalorder %s730_s18, 1 }
   0xa   : > { %p1126_p4 = por %p1116_p1, %p53_p0  ;;  %p731_p5 = scmp.ge.s32.totalorder %s1050_s16, 1 }
   0xb   : > { %p1131_p6 = por %p111_p3, %p53_p0  ;;  %p118_p7 = scmp.lt.s32.totalorder %s1050_s16, 3 }
   0xc   : > { %s1379_s21 = scalar_select %p1126_p4, 1, 0 }
   0xd   : > { %s1380_s22 = scalar_select %p1131_p6, 1, 0 }
   0xe   : > { %p1136_p8 = pnand %p731_p5, %p118_p7  ;;  %s1052_s24 = smov [#allocation7]  }
   0xf   : > { %s133_s25 = sshll.u32 %s1052_s24, 4  ;;  %s30_s27 = sadd.s32 1, %s1046_s15  ;;  %s134_s25 = int_to_ptr.vmem [resolvable:$true] %s133_s25 }
  0x10   : > { %p808_p9 = pneg %p1136_p8  ;;  %s923_s28 = scalar_lea.vmem %s134_s25, 2048 }
  0x11   : > { %p924_p13 = scmp.ne.s32.totalorder %s134_s25, %s923_s28  ;;  %p931_p5 = scmp.lt.s32.totalorder %s134_s25, %s134_s25 }
  0x12   : > { %p1145_p11 = pnand %p808_p9, %p1116_p1  ;;  %p932_p7 = scmp.lt.s32.totalorder %s923_s28, %s923_s28 }
  0x14   : > { %p914_p12 = pneg %p1145_p11  ;;  %p933_p6 = por %p932_p7, %p931_p5 }
  0x16   : > { %p926_p0 = pnand %p924_p13, %p914_p12 }
  0x18   : > { %p927_p3 = pneg %p926_p0 }
  0x1a   : > { %p934_p4 = pnand %p933_p6, %p927_p3 }
  0x1c   : > { %937 = shalt.err (!%p934_p4)
}
  0x1d   : > { %s1053_s29 = smov 128   ;;  %s1054_s30 = smov 8  }
  0x1e   : > { %811 = dma.hbm_to_vmem [thread:$0]  (!%p1145_p11), %s1374_s2, 2048, %s134_s25, [#allocation8], %s1053_s29, %s1053_s29, %s1054_s30  }
  0x1f   : > { %p31_p6 = scmp.ge.s32.totalorder %s30_s27, 2  ;;  %s40_s6 = sadd.s32 1, %s1038_s14 }
  0x20   : > { %p47_p4 = scmp.ne.s32.totalorder %s1038_s14, %s1034_s13  ;;  %p48_p9 = scmp.eq.s32.totalorder %s1050_s16, 0 }
  0x21   : > { %s1395_s27 = smov (%p31_p6, %s30_s27), 0  ;;  %p821_p0 = scmp.lt.s32.totalorder %s1050_s16, 2 }
  0x22   : > { %p1163_p12 = por %p48_p9, %p47_p4  ;;  %p1169_p13 = por %p1120_p2, %p47_p4 }
  0x23   : > { %s37_s9 = ssub.s32 %s1046_s15, %s1395_s27  ;;  %s147_s10 = sand.u32 1, %s1038_s14  }
  0x24   : > { %p38_p11 = scmp.eq.s32.totalorder %s37_s9, 0  ;;  %s734_s11 = sshll.u32 %s147_s10, 5 }
  0x25   : > { %s774_s18 = sshll.u32 %s1046_s15, 9  ;;  %s151_s28 = scalar_lea.vmem [#allocation4], %s734_s11 }
  0x26   : > { %s1178_s17 = scalar_select %p38_p11, %s1038_s14, %s40_s6  }
  0x27   : > { %s157_s26 = scalar_lea.hbm %s1373_s1, %s774_s18  ;;  %s158_s29 = sshll.u32 %s151_s28, 4  ;;  %s159_s29 = int_to_ptr.vmem [resolvable:$true] %s158_s29 }
  0x28   : > { %p1186_p2 = pnand %p821_p0, %p1163_p12  ;;  %s148_s30 = scalar_lea.sflag [#allocation5], %s147_s10 }
  0x29   : > { %s951_s4 = scalar_lea.vmem %s159_s29, 512  ;;  %s1055_s5 = smov [#allocation4]  }
  0x2a   : > { %p940_p3 = pneg %p1186_p2  ;;  %p952_p5 = scmp.ne.s32.totalorder %s159_s29, %s951_s4 }
  0x2b   : > { %s956_s6 = sshll.u32 %s1055_s5, 4  ;;  %s957_s6 = int_to_ptr.vmem [resolvable:$false] %s956_s6 }
  0x2c   : > { %p954_p7 = pnand %p952_p5, %p940_p3  ;;  %s958_s9 = scalar_lea.vmem %s957_s6, 1024 }
  0x2d   : > { %p959_p4 = scmp.lt.s32.totalorder %s159_s29, %s957_s6  ;;  %p960_p9 = scmp.lt.s32.totalorder %s958_s9, %s951_s4 }
  0x2e   : > { %p955_p6 = pneg %p954_p7 }
  0x2f   : > { %p961_p11 = por %p960_p9, %p959_p4 }
  0x31   : > { %p962_p10 = pnand %p961_p11, %p955_p6 }
  0x33   : > { %965 = shalt.err (!%p962_p10)
}
  0x34   : > { %s1056_s7 = smov 64   ;;  %s1057_s11 = smov 4  }
  0x35   : > { %815 = dma.hbm_to_vmem [thread:$0]  (!%p1186_p2), %s157_s26, 512, %s159_s29, %s148_s30, %s1056_s7, %s1056_s7, %s1057_s11  }
  0x36   : > { %170 = sbr.rel (%p1136_p8) target bundleno = 408 (0x198), region = 28  ;;  %s1197_s10 = sand.u32 (!%p1136_p8), 1, %s1034_s13  }
  0x37   : > { %s738_s18 = sshll.u32 (!%p1136_p8), %s1197_s10, 5  ;;  %s173_s24 = scalar_lea.sflag (!%p1136_p8), [#allocation5], %s1197_s10 }
  0x38   : > { %s1201_s25 = scalar_lea.vmem (!%p1136_p8), [#allocation4], %s738_s18  ;;  %p1386_p12 = scmp.ne.s32.totalorder (!%p1136_p8), %s1379_s21, 0 }
  0x3b   : > { %1017 = dma.done.wait (%p1386_p12), %s173_s24, 512  }
  0x3c   : > { %1019 = vsyncadd (%p1386_p12), %s173_s24, 4294966784 }
  0x3d   : > { %1021 = dma.done.wait (%p1116_p1), [#allocation8], 2048  }
  0x3e   : > { %1023 = vsyncadd (%p1116_p1), [#allocation8], 4294965248  ;;  %v1058_v0 = vmov 0   ;;  %v880_v1 = vld [vmem:[#allocation7 + $0x74] ss:$8 sps:$4 sm:$0xff]   ;;  %v904_v17 = vld [vmem:[%s1201_s25] sm:$0xff]  }
  0x3f   : > { %364 = vmatprep.mubr.bf16.mxu0 %v1058_v0  ;;  %384 = vmatprep.mubr.bf16.mxu1 %v1058_v0  ;;  %v882_v2 = vld [vmem:[#allocation7 + $0x70] ss:$8 sps:$4 sm:$0xff]   ;;  %v883_v3 = vld [vmem:[#allocation7 + $0x64] ss:$8 sps:$4 sm:$0xff]   ;;  %v885_v4 = vld [vmem:[#allocation7 + $0x60] ss:$8 sps:$4 sm:$0xff]  }
  0x40   : > { %332 = vmatprep.subr.bf16.mxu0 %v880_v1  ;;  %784 = vmatprep.subr.bf16.mxu1 %v880_v1  ;;  %v886_v5 = vld [vmem:[#allocation7 + $0x54] ss:$8 sps:$4 sm:$0xff]   ;;  %v888_v6 = vld [vmem:[#allocation7 + $0x50] ss:$8 sps:$4 sm:$0xff]   ;;  %v889_v7 = vld [vmem:[#allocation7 + $0x44] ss:$8 sps:$4 sm:$0xff]  }
  0x41   : > { %333 = vmatpush1.bf16.msra.mxu0 %v882_v2  ;;  %792 = vmatpush1.bf16.msra.mxu1 %v882_v2  ;;  %v891_v8 = vld [vmem:[#allocation7 + $0x40] ss:$8 sps:$4 sm:$0xff]   ;;  %v892_v9 = vld [vmem:[#allocation7 + $0x34] ss:$8 sps:$4 sm:$0xff]   ;;  %v894_v10 = vld [vmem:[#allocation7 + $0x30] ss:$8 sps:$4 sm:$0xff]  }
  0x42   : > { %334 = vmatprep.subr.bf16.mxu0 %v883_v3  ;;  %785 = vmatprep.subr.bf16.mxu1 %v883_v3  ;;  %v895_v11 = vld [vmem:[#allocation7 + $0x24] ss:$8 sps:$4 sm:$0xff]   ;;  %v897_v12 = vld [vmem:[#allocation7 + $0x20] ss:$8 sps:$4 sm:$0xff]   ;;  %v898_v13 = vld [vmem:[#allocation7 + $0x14] ss:$8 sps:$4 sm:$0xff]  }
  0x43   : > { %v900_v14 = vld [vmem:[#allocation7 + $0x10] ss:$8 sps:$4 sm:$0xff]   ;;  %v901_v15 = vld [vmem:[#allocation7 + $0x4] ss:$8 sps:$4 sm:$0xff]   ;;  %v903_v16 = vld [vmem:[#allocation7] ss:$8 sps:$4 sm:$0xff]  }
  0x44   : > { %v905_v18 = vld [vmem:[%s1201_s25 + $0x10] sm:$0xff]   ;;  %v906_v19 = vld [vmem:[%s1201_s25 + $0x8] sm:$0xff]   ;;  %v907_v20 = vld [vmem:[%s1201_s25 + $0x18] sm:$0xff]   ;;  %s740_s19 = sshll.u32 %s1197_s10, 6  ;;  %s783_s21 = sshll.u32 %s1042_s0, 10 }
  0x45   : > { %335 = vmatpush1.bf16.msra.mxu0 %v885_v4  ;;  %793 = vmatpush1.bf16.msra.mxu1 %v885_v4  ;;  %s1299_s23 = scalar_lea.vmem [#allocation9], %s740_s19  ;;  %s1314_s29 = scalar_lea.hbm %s1375_s3, %s783_s21 }
  0x46   : > { %336 = vmatprep.subr.bf16.mxu0 %v886_v5  ;;  %786 = vmatprep.subr.bf16.mxu1 %v886_v5  ;;  %s633_s26 = sshll.u32 %s1299_s23, 4  ;;  %s618_s20 = scalar_lea.sflag [#allocation6], %s1197_s10  ;;  %s1316_s26 = int_to_ptr.vmem [resolvable:$true] %s633_s26 }
  0x47   : > { %s966_s30 = scalar_lea.vmem %s1316_s26, 1024  ;;  %s1059_s4 = smov [#allocation9]  }
  0x48   : > { %p967_p1 = scmp.ne.s32.totalorder %s1316_s26, %s966_s30  ;;  %s970_s5 = sshll.u32 %s1059_s4, 4  ;;  %s971_s5 = int_to_ptr.vmem [resolvable:$false] %s970_s5 }
  0x49   : > { %337 = vmatpush1.bf16.msra.mxu0 %v888_v6  ;;  %794 = vmatpush1.bf16.msra.mxu1 %v888_v6  ;;  %s972_s6 = scalar_lea.vmem %s971_s5, 2048  ;;  %p973_p0 = scmp.lt.s32.totalorder %s1316_s26, %s971_s5 }
  0x4a   : > { %338 = vmatprep.subr.bf16.mxu0 %v889_v7  ;;  %787 = vmatprep.subr.bf16.mxu1 %v889_v7  ;;  %p968_p8 = pnand %p967_p1, %p1169_p13  ;;  %p974_p2 = scmp.lt.s32.totalorder %s972_s6, %s966_s30 }
  0x4c   : > { %p969_p10 = pneg %p968_p8  ;;  %p975_p3 = por %p974_p2, %p973_p0 }
  0x4d   : > { %339 = vmatpush1.bf16.msra.mxu0 %v891_v8  ;;  %795 = vmatpush1.bf16.msra.mxu1 %v891_v8 }
  0x4e   : > { %340 = vmatprep.subr.bf16.mxu0 %v892_v9  ;;  %788 = vmatprep.subr.bf16.mxu1 %v892_v9  ;;  %p976_p5 = pnand %p975_p3, %p969_p10 }
  0x51   : > { %341 = vmatpush1.bf16.msra.mxu0 %v894_v10  ;;  %796 = vmatpush1.bf16.msra.mxu1 %v894_v10 }
  0x52   : > { %342 = vmatprep.subr.bf16.mxu0 %v895_v11  ;;  %789 = vmatprep.subr.bf16.mxu1 %v895_v11 }
  0x55   : > { %343 = vmatpush1.bf16.msra.mxu0 %v897_v12  ;;  %797 = vmatpush1.bf16.msra.mxu1 %v897_v12 }
  0x56   : > { %344 = vmatprep.subr.bf16.mxu0 %v898_v13  ;;  %790 = vmatprep.subr.bf16.mxu1 %v898_v13 }
  0x59   : > { %345 = vmatpush1.bf16.msra.mxu0 %v900_v14  ;;  %798 = vmatpush1.bf16.msra.mxu1 %v900_v14 }
  0x5a   : > { %346 = vmatprep.subr.bf16.mxu0 %v901_v15  ;;  %791 = vmatprep.subr.bf16.mxu1 %v901_v15 }
  0x5d   : > { %347 = vmatpush1.bf16.msra.mxu0 %v903_v16  ;;  %799 = vmatpush1.bf16.msra.mxu1 %v903_v16 }
  0x60   : > { %365 = vmatmul.mubr.bf16.vlgmr.msra.gmra.mxu0 %v904_v17  ;;  %385 = vmatmul.mubr.bf16.vlgmr.msra.gmra.mxu1 %v905_v18 }
  0x61   : > { %374 = vmatprep.mubr.bf16.mxu0 %v1058_v0  ;;  %394 = vmatprep.mubr.bf16.mxu1 %v1058_v0 }
  0x68   : > { %375 = vmatmul.mubr.bf16.gmra.mxu0 %v906_v19  ;;  %395 = vmatmul.mubr.bf16.gmra.mxu1 %v907_v20 }
 0x120   : > { %v366_v21 = vpop.f32.mrf.mxu0  ;;  %v386_v22 = vpop.f32.mrf.mxu1 }
 0x122   : > { %v368_v23 = vpop.f32.mrf.mxu0  ;;  %v1215_v24 = vpop.f32.mrf.mxu1 }
 0x124   : > { %v370_v25 = vpop.f32.mrf.mxu0  ;;  %v390_v26 = vpop.f32.mrf.mxu1 }
 0x125   : > { %v405_v30 = vadd.f32 %v370_v25, %v366_v21 }
 0x126   : > { %v372_v27 = vpop.f32.mrf.mxu0  ;;  %v1217_v28 = vpop.f32.mrf.mxu1 }
 0x127   : > { %v418_v33 = vadd.f32 %v372_v27, %v368_v23 }
 0x128   : > { %v376_v29 = vpop.f32.mrf.mxu0  ;;  %v396_v32 = vpop.f32.mrf.mxu1 }
 0x129   : > { %v406_v34 = vadd.f32 %v405_v30, %v376_v29 }
 0x12a   : > { %v378_v31 = vpop.f32.mrf.mxu0  ;;  %v398_v38 = vpop.f32.mrf.mxu1 }
 0x12b   : > { %v419_v36 = vadd.f32 %v418_v33, %v378_v31 }
 0x12c   : > { %v380_v35 = vpop.f32.mrf.mxu0  ;;  %v400_v44 = vpop.f32.mrf.mxu1 }
 0x12d   : > { %v407_v37 = vadd.f32 %v406_v34, %v380_v35 }
 0x12e   : > { %v382_v39 = vpop.f32.mrf.mxu0  ;;  %v402_v49 = vpop.f32.mrf.mxu1 }
 0x12f   : > { %v408_v40 = vadd.f32 %v407_v37, %v386_v22  ;;  %v420_v41 = vadd.f32 %v419_v36, %v382_v39 }
 0x131   : > { %v421_v42 = vadd.f32 %v420_v41, %v1215_v24  ;;  %v409_v43 = vadd.f32 %v408_v40, %v390_v26 }
 0x133   : > { %v410_v45 = vadd.f32 %v409_v43, %v396_v32  ;;  %v422_v46 = vadd.f32 %v421_v42, %v1217_v28 }
 0x135   : > { %v411_v47 = vadd.f32 %v410_v45, %v400_v44  ;;  %v423_v48 = vadd.f32 %v422_v46, %v398_v38 }
 0x137   : > { %v412_v50 = vrot.slane %v411_v47, 4  ;;  %v424_v51 = vadd.f32 %v423_v48, %v402_v49 }
 0x139   : > { %v413_v52 = vadd.f32 %v412_v50, %v411_v47  ;;  %v425_v53 = vrot.slane %v424_v51, 4 }
 0x13b   : > { %v414_v54 = vrot.slane %v413_v52, 2  ;;  %v426_v55 = vadd.f32 %v425_v53, %v424_v51 }
 0x13d   : > { %v415_v56 = vadd.f32 %v414_v54, %v413_v52  ;;  %v427_v57 = vrot.slane %v426_v55, 2 }
 0x13f   : > { %v416_v58 = vrot.slane %v415_v56, 1  ;;  %v428_v59 = vadd.f32 %v427_v57, %v426_v55 }
 0x141   : > { %v417_v60 = vadd.f32 %v416_v58, %v415_v56  ;;  %v429_v61 = vrot.slane %v428_v59, 1 }
 0x143   : > { %v431_v62 = vmul.f32 0.015625, %v417_v60  ;;  %v430_v2 = vadd.f32 %v429_v61, %v428_v59 }
 0x145   : > { %v1221_v63 = vsub.f32 %v366_v21, %v431_v62  ;;  %v1223_v0 = vsub.f32 %v370_v25, %v431_v62  ;;  %v1225_v1 = vsub.f32 %v376_v29, %v431_v62  ;;  %v1227_v3 = vsub.f32 %v380_v35, %v431_v62 }
 0x146   : > { %v1233_v6 = vsub.f32 %v386_v22, %v431_v62  ;;  %v432_v9 = vmul.f32 0.015625, %v430_v2  ;;  %v443_v10 = vsub.f32 %v390_v26, %v431_v62  ;;  %v445_v16 = vsub.f32 %v396_v32, %v431_v62 }
 0x147   : > { %v449_v4 = vmul.f32 %v1221_v63, %v1221_v63  ;;  %v451_v5 = vmul.f32 %v1223_v0, %v1223_v0  ;;  %v453_v7 = vmul.f32 %v1225_v1, %v1225_v1  ;;  %v455_v11 = vmul.f32 %v1227_v3, %v1227_v3 }
 0x148   : > { %v1239_v13 = vsub.f32 %v368_v23, %v432_v9  ;;  %v1241_v14 = vsub.f32 %v372_v27, %v432_v9  ;;  %v1243_v15 = vsub.f32 %v378_v31, %v432_v9  ;;  %v457_v17 = vmul.f32 %v1233_v6, %v1233_v6 }
 0x149   : > { %v465_v8 = vadd.f32 %v451_v5, %v449_v4  ;;  %v1247_v19 = vsub.f32 %v382_v39, %v432_v9  ;;  %v447_v22 = vsub.f32 %v400_v44, %v431_v62  ;;  %v459_v23 = vmul.f32 %v443_v10, %v443_v10 }
 0x14a   : > { %v450_v20 = vmul.f32 %v1239_v13, %v1239_v13  ;;  %v452_v21 = vmul.f32 %v1241_v14, %v1241_v14  ;;  %v1254_v26 = vsub.f32 %v1215_v24, %v432_v9  ;;  %v454_v27 = vmul.f32 %v1243_v15, %v1243_v15 }
 0x14b   : > { %v466_v12 = vadd.f32 %v465_v8, %v453_v7  ;;  %v461_v30 = vmul.f32 %v445_v16, %v445_v16  ;;  %v1259_v32 = vsub.f32 %v1217_v28, %v432_v9  ;;  %v456_v33 = vmul.f32 %v1247_v19, %v1247_v19 }
 0x14c   : > { %v478_v29 = vadd.f32 %v452_v21, %v450_v20  ;;  %v463_v35 = vmul.f32 %v447_v22, %v447_v22  ;;  %v1263_v37 = vsub.f32 %v398_v38, %v432_v9  ;;  %v458_v24 = vmul.f32 %v1254_v26, %v1254_v26 }
 0x14d   : > { %v467_v18 = vadd.f32 %v466_v12, %v455_v11  ;;  %v1267_v41 = vsub.f32 %v402_v49, %v432_v9  ;;  %v460_v42 = vmul.f32 %v1259_v32, %v1259_v32 }
 0x14e   : > { %v479_v34 = vadd.f32 %v478_v29, %v454_v27  ;;  %v462_v44 = vmul.f32 %v1263_v37, %v1263_v37 }
 0x14f   : > { %v468_v25 = vadd.f32 %v467_v18, %v457_v17  ;;  %v464_v38 = vmul.f32 %v1267_v41, %v1267_v41 }
 0x150   : > { %v480_v39 = vadd.f32 %v479_v34, %v456_v33 }
 0x151   : > { %v469_v31 = vadd.f32 %v468_v25, %v459_v23 }
 0x152   : > { %v481_v28 = vadd.f32 %v480_v39, %v458_v24 }
 0x153   : > { %v470_v36 = vadd.f32 %v469_v31, %v461_v30 }
 0x154   : > { %v482_v45 = vadd.f32 %v481_v28, %v460_v42 }
 0x155   : > { %v471_v40 = vadd.f32 %v470_v36, %v463_v35 }
 0x156   : > { %v483_v47 = vadd.f32 %v482_v45, %v462_v44 }
 0x157   : > { %v472_v43 = vrot.slane %v471_v40, 4 }
 0x158   : > { %v484_v50 = vadd.f32 %v483_v47, %v464_v38 }
 0x159   : > { %v473_v46 = vadd.f32 %v472_v43, %v471_v40 }
 0x15a   : > { %v485_v52 = vrot.slane %v484_v50, 4 }
 0x15b   : > { %v474_v48 = vrot.slane %v473_v46, 2 }
 0x15c   : > { %v486_v53 = vadd.f32 %v485_v52, %v484_v50 }
 0x15d   : > { %v475_v51 = vadd.f32 %v474_v48, %v473_v46 }
 0x15e   : > { %v487_v55 = vrot.slane %v486_v53, 2 }
 0x15f   : > { %v476_v49 = vrot.slane %v475_v51, 1 }
 0x160   : > { %v488_v57 = vadd.f32 %v487_v55, %v486_v53 }
 0x161   : > { %v477_v54 = vadd.f32 %v476_v49, %v475_v51 }
 0x162   : > { %v489_v59 = vrot.slane %v488_v57, 1 }
 0x163   : > { %v491_v56 = vmul.f32 0.015625, %v477_v54 }
 0x164   : > { %v490_v60 = vadd.f32 %v489_v59, %v488_v57 }
 0x165   : > { %v493_v58 = vadd.f32 1e-05, %v491_v56 }
 0x166   : > { %v492_v61 = vmul.f32 0.015625, %v490_v60 }
 0x167   : > { %908 = vrsqrt.f32 %v493_v58 }
 0x168   : > { %v494_v62 = vadd.f32 1e-05, %v492_v61 }
 0x16a   : > { %910 = vrsqrt.f32 %v494_v62 }
 0x174   : > { %v909_v2 = vpop.eup %908 }
 0x175   : > { %v497_v4 = vmul.f32 %v909_v2, %v1221_v63  ;;  %v499_v5 = vmul.f32 %v909_v2, %v1223_v0  ;;  %v501_v7 = vmul.f32 %v909_v2, %v1225_v1  ;;  %v503_v8 = vmul.f32 %v909_v2, %v1227_v3 }
 0x176   : > { %v505_v9 = vmul.f32 %v909_v2, %v1233_v6  ;;  %v507_v11 = vmul.f32 %v909_v2, %v443_v10  ;;  %v509_v12 = vmul.f32 %v909_v2, %v445_v16  ;;  %v511_v17 = vmul.f32 %v909_v2, %v447_v22 }
 0x177   : > { %vm513_vm0 = vcmp.ge.f32.partialorder %v497_v4, 0.0  ;;  %vm515_vm1 = vcmp.ge.f32.partialorder %v499_v5, 0.0  ;;  %vm517_vm2 = vcmp.ge.f32.partialorder %v501_v7, 0.0  ;;  %vm519_vm3 = vcmp.ge.f32.partialorder %v503_v8, 0.0  ;;  %v911_v20 = vpop.eup %910 }
 0x178   : > { %vm521_vm4 = vcmp.ge.f32.partialorder %v505_v9, 0.0  ;;  %vm523_vm5 = vcmp.ge.f32.partialorder %v507_v11, 0.0  ;;  %vm525_vm6 = vcmp.ge.f32.partialorder %v509_v12, 0.0  ;;  %v529_v63 = vmul.f32 0.2, %v497_v4 }
 0x179   : > { %v531_v18 = vmul.f32 0.2, %v499_v5  ;;  %v533_v0 = vmul.f32 0.2, %v501_v7  ;;  %v535_v1 = vmul.f32 0.2, %v503_v8  ;;  %v498_v31 = vmul.f32 %v911_v20, %v1239_v13 }
 0x17a   : > { %v537_v21 = vmul.f32 0.2, %v505_v9  ;;  %v539_v3 = vmul.f32 0.2, %v507_v11  ;;  %vm527_vm7 = vcmp.ge.f32.partialorder %v511_v17, 0.0  ;;  %v545_v16 = vsel %vm513_vm0, %v497_v4, %v529_v63 }
 0x17b   : > { %v541_v6 = vmul.f32 0.2, %v509_v12  ;;  %v543_v10 = vmul.f32 0.2, %v511_v17  ;;  %v547_v22 = vsel %vm515_vm1, %v499_v5, %v531_v18  ;;  %v549_v23 = vsel %vm517_vm2, %v501_v7, %v533_v0 }
 0x17c   : > { %v551_v25 = vsel %vm519_vm3, %v503_v8, %v535_v1  ;;  %v553_v27 = vsel %vm521_vm4, %v505_v9, %v537_v21  ;;  %v555_v29 = vsel %vm523_vm5, %v507_v11, %v539_v3  ;;  %v500_v33 = vmul.f32 %v911_v20, %v1241_v14 }
 0x17d   : > { %v557_v30 = vsel %vm525_vm6, %v509_v12, %v541_v6  ;;  %v502_v34 = vmul.f32 %v911_v20, %v1243_v15  ;;  %v504_v35 = vmul.f32 %v911_v20, %v1247_v19  ;;  %v506_v36 = vmul.f32 %v911_v20, %v1254_v26 }
 0x17e   : > { %v508_v24 = vmul.f32 %v911_v20, %v1259_v32  ;;  %v510_v39 = vmul.f32 %v911_v20, %v1263_v37  ;;  %v512_v40 = vmul.f32 %v911_v20, %v1267_v41  ;;  %vm514_vm8 = vcmp.ge.f32.partialorder %v498_v31, 0.0 }
 0x17f   : > { %vm516_vm9 = vcmp.ge.f32.partialorder %v500_v33, 0.0  ;;  %vm518_vm10 = vcmp.ge.f32.partialorder %v502_v34, 0.0  ;;  %vm520_vm11 = vcmp.ge.f32.partialorder %v504_v35, 0.0  ;;  %vm522_vm12 = vcmp.ge.f32.partialorder %v506_v36, 0.0 }
 0x180   : > { %vm524_vm13 = vcmp.ge.f32.partialorder %v508_v24, 0.0  ;;  %vm526_vm14 = vcmp.ge.f32.partialorder %v510_v39, 0.0  ;;  %vm528_vm15 = vcmp.ge.f32.partialorder %v512_v40, 0.0  ;;  %v530_v13 = vmul.f32 0.2, %v498_v31 }
 0x181   : > { %v532_v14 = vmul.f32 0.2, %v500_v33  ;;  %v559_v15 = vsel %vm527_vm7, %v511_v17, %v543_v10  ;;  %v534_v19 = vmul.f32 0.2, %v502_v34  ;;  %v536_v26 = vmul.f32 0.2, %v504_v35 }
 0x182   : > { %v538_v32 = vmul.f32 0.2, %v506_v36  ;;  %v540_v37 = vmul.f32 0.2, %v508_v24  ;;  %v542_v41 = vmul.f32 0.2, %v510_v39  ;;  %v546_v28 = vsel %vm514_vm8, %v498_v31, %v530_v13 }
 0x183   : > { %v544_v42 = vmul.f32 0.2, %v512_v40  ;;  %v548_v43 = vsel %vm516_vm9, %v500_v33, %v532_v14  ;;  %v550_v44 = vsel %vm518_vm10, %v502_v34, %v534_v19  ;;  %v552_v45 = vsel %vm520_vm11, %v504_v35, %v536_v26 }
 0x184   : > { %v554_v46 = vsel %vm522_vm12, %v506_v36, %v538_v32  ;;  %v556_v38 = vsel %vm524_vm13, %v508_v24, %v540_v37  ;;  %v558_v47 = vsel %vm526_vm14, %v510_v39, %v542_v41  ;;  %v775_v50 = vpack.c.bf16 %v546_v28, %v545_v16 }
 0x185   : > { %v560_v48 = vsel %vm528_vm15, %v512_v40, %v544_v42  ;;  %v776_v51 = vpack.c.bf16 %v548_v43, %v547_v22  ;;  %v777_v52 = vpack.c.bf16 %v550_v44, %v549_v23  ;;  %v778_v49 = vpack.c.bf16 %v552_v45, %v551_v25 }
 0x186   : > { %v779_v53 = vpack.c.bf16 %v554_v46, %v553_v27  ;;  %v780_v54 = vpack.c.bf16 %v556_v38, %v555_v29  ;;  %v781_v55 = vpack.c.bf16 %v558_v47, %v557_v30  ;;  %v782_v56 = vpack.c.bf16 %v560_v48, %v559_v15  ;;  %609 = vst [vmem:[%s1299_s23] sm:$0xff] %v775_v50 }
 0x187   : > { %610 = vst [vmem:[%s1299_s23 + $0x8] sm:$0xff] %v776_v51  ;;  %611 = vst [vmem:[%s1299_s23 + $0x10] sm:$0xff] %v777_v52 }
 0x188   : > { %612 = vst [vmem:[%s1299_s23 + $0x18] sm:$0xff] %v778_v49  ;;  %613 = vst [vmem:[%s1299_s23 + $0x20] sm:$0xff] %v779_v53 }
 0x189   : > { %614 = vst [vmem:[%s1299_s23 + $0x28] sm:$0xff] %v780_v54  ;;  %615 = vst [vmem:[%s1299_s23 + $0x30] sm:$0xff] %v781_v55 }
 0x18a   : > { %616 = vst [vmem:[%s1299_s23 + $0x38] sm:$0xff] %v782_v56 }
 0x18b   : > { %979 = shalt.err (!%p976_p5)
}
 0x18c   : > { %s980_s9 = scalar_lea.hbm %s1314_s29, 1024  ;;  %s984_s18 = scalar_lea.hbm %s1375_s3, 2048 }
 0x18d   : > { %p981_p7 = scmp.ne.s32.totalorder %s1314_s29, %s980_s9  ;;  %p985_p9 = scmp.lt.s32.totalorder %s1314_s29, %s1375_s3 }
 0x18e   : > { %p986_p11 = scmp.lt.s32.totalorder %s984_s18, %s980_s9 }
 0x18f   : > { %p982_p6 = pnand %p981_p7, %p1169_p13 }
 0x190   : > { %p987_p12 = por %p986_p11, %p985_p9 }
 0x191   : > { %p983_p4 = pneg %p982_p6 }
 0x193   : > { %p988_p1 = pnand %p987_p12, %p983_p4 }
 0x195   : > { %991 = shalt.err (!%p988_p1)
}
 0x196   : > { %s1060_s19 = smov 128   ;;  %s1061_s21 = smov 8  }
 0x197   : > { %806 = dma.vmem_to_hbm [thread:$0]  (%p1169_p13), %s1316_s26, 1024, %s1314_s29, %s618_s20, %s1060_s19, %s1060_s19, %s1061_s21  }
 0x198 PF: > { %s648_s23 = sand.u32 1, %s1030_s12   ;;  %p1387_p8 = scmp.ne.s32.totalorder %s1380_s22, 0 }
 0x199   : > { %p1388_p10 = scmp.ge.s32.totalorder %s1050_s16, 2  ;;  %s649_s0 = scalar_lea.sflag [#allocation6], %s648_s23 }
 0x19b   : > { %p817_p0 = pnand %p1388_p10, %p1387_p8 }
 0x19d   : > { %p818_p2 = pneg %p817_p0 }
 0x19f   : > { %1025 = dma.done.wait (%p818_p2), %s649_s0, 1024  }
 0x1a0   : > { %1027 = vsyncadd (%p818_p2), %s649_s0, 4294966272  ;;  %s21_s16 = sadd.s32 1, %s1050_s16   ;;  %s1389_s12 = smov %s1034_s13 }
 0x1a1   : > { %p18_p3 = scmp.ge.s32.totalorder %s21_s16, 4   ;;  %s1390_s13 = smov %s1038_s14 }
 0x1a2   : > { %s1391_s14 = smov %s1178_s17  ;;  %s1392_s0 = smov %s1046_s15 }
 0x1a3   : > { %s1393_s15 = smov %s1395_s27  ;;  %20 = sbr.rel (!%p18_p3) target bundleno = 7 (0x7), region = 78 }
 0x1a8   :  { %654 = vsyncpa [#allocation5], 1 }
 0x1a9   :  { %656 = vsyncpa [#allocation5 + $0x1], 1 }
 0x1aa   :  { %657 = vsyncpa [#allocation8], 1 }
 0x1ab   :  { %658 = vsyncpa [#allocation6], 1 }
 0x1ac   :  { %660 = vsyncpa [#allocation6 + $0x1], 1 }

</bundles_post_ra>
